<compile_context>
chip_gen: v7x
topology: tpu7x:2x2x1
jax: 0.10.0
libtpu: 0.0.40
codegen_flags: <defaults>
</compile_context>

<pallas_src>
import functools

import jax
import jax.numpy as jnp
from jax.experimental import pallas as pl
from jax.experimental.pallas import tpu as pltpu


def _gem_kernel(p_ref, x_ref, o_ref, *, eps, nc, tm):
    # p_ref: (2,) f32 in SMEM -> [p, 1/p]
    # x_ref: (TM, HW) native-dtype tile in VMEM
    # o_ref: (1, 1, TM) output tile in VMEM (lane-dense)
    p = p_ref[0]
    inv_p = p_ref[1]

    x = x_ref[...].astype(jnp.float32)        # upcast in-kernel (hidden by DMA)
    xc = jnp.maximum(x, eps)                  # clamp(min=eps), eps > 0 keeps log finite

    # Mask rows past NC (ragged last tile reads undefined padding from the
    # block DMA) with benign 1.0 so the transcendental chain stays finite.
    row_id = pl.program_id(0) * tm + jax.lax.broadcasted_iota(jnp.int32, (tm, 1), 0)
    xc = jnp.where(row_id < nc, xc, 1.0)

    xp = jnp.exp(p * jnp.log(xc))             # xc ** p (p is a runtime scalar)
    m = jnp.mean(xp, axis=-1, keepdims=True)  # (TM, 1): avg_pool2d over full (H, W)
    res = jnp.exp(jnp.log(m) * inv_p)         # m ** (1/p)

    # Lane-dense store: (TM, 1) column -> (1, TM) row (single XLU transpose).
    o_ref[0] = jnp.transpose(res).astype(o_ref.dtype)


def _choose_tm(nc, hw, in_bytes):
    """Rows per grid step.  Budget the double-buffered native-dtype DMA tile
    plus worst-case f32 temporaries well under the explicit 48 MiB VMEM limit
    (v7x has 64 MiB physical per TC; v5e/v6e have 128 MiB)."""
    lane_hw = ((hw + 127) // 128) * 128       # VMEM footprint uses padded lane width
    # 2x double-buffered native input + up to ~3 materialized (TM, lane_hw) f32 temps
    per_row = lane_hw * (2 * in_bytes + 3 * 4)
    budget = 28 * 1024 * 1024
    tm = max(8, int(budget // per_row) // 8 * 8)
    # Keep >= ~4 grid steps when there are enough rows so the "parallel" axis
    # shards across TensorCores (2 TCs on v7x) and the DMA pipeline has depth.
    if nc >= 4 * 8:
        tm = min(tm, max(8, (nc // 4) // 8 * 8))
    # Never exceed the sublane-rounded row count.
    tm = min(tm, ((nc + 7) // 8) * 8)
    return int(tm)


def gem_pallas(x, p, eps=1e-6):
    """x: (N, C, H, W); p: (1,) float32. Returns (N, C, 1, 1) in x.dtype."""
    N, C, H, W = x.shape
    NC, HW = N * C, H * W
    x2d = x.reshape(NC, HW)                   # native dtype; upcast happens in-kernel

    p = p.reshape(-1).astype(jnp.float32)[:1]
    p_and_invp = jnp.concatenate([p, 1.0 / p])   # hoist 1/p out of the kernel

    TM = _choose_tm(NC, HW, x.dtype.itemsize)
    num_tiles = pl.cdiv(NC, TM)

    out = pl.pallas_call(
        functools.partial(_gem_kernel, eps=float(eps), nc=NC, tm=TM),
        out_shape=jax.ShapeDtypeStruct((num_tiles, 1, TM), x.dtype),
        grid=(num_tiles,),
        in_specs=[
            pl.BlockSpec(memory_space=pltpu.SMEM),        # [p, 1/p] scalars, untiled
            pl.BlockSpec((TM, HW), lambda i: (i, 0)),      # x row-tile (ragged tail masked in-kernel)
        ],
        out_specs=pl.BlockSpec((1, 1, TM), lambda i: (i, 0, 0)),  # lane-dense rows
        compiler_params=pltpu.CompilerParams(
            dimension_semantics=("parallel",),
            vmem_limit_bytes=48 * 1024 * 1024,
        ),
    )(p_and_invp, x2d)

    return out.reshape(num_tiles * TM)[:NC].reshape(N, C, 1, 1)


def gem_reference(x, p, eps=1e-6):
    xc = jnp.maximum(x.astype(jnp.float32), eps)
    xp = xc ** p[0]
    m = jnp.mean(xp, axis=(-2, -1), keepdims=True)
    return (m ** (1.0 / p[0])).astype(x.dtype)


if __name__ == "__main__":
    key = jax.random.PRNGKey(0)
    N, C, H, W = 2, 4, 16, 16
    x = jax.random.normal(key, (N, C, H, W), dtype=jnp.float32)

    # Deterministic parameter init, matching nn.Parameter(torch.ones(1) * 3).
    p = jnp.ones((1,), dtype=jnp.float32) * 3.0

    y = gem_pallas(x, p, eps=1e-6)
    jax.block_until_ready(y)

    y_ref = gem_reference(x, p, eps=1e-6)
    assert y.shape == (N, C, 1, 1)
    assert jnp.allclose(y, y_ref, rtol=1e-4, atol=1e-5), (
        f"max abs diff {jnp.max(jnp.abs(y - y_ref))}")

    print("KERNEL_OK")
</pallas_src>

<mosaic_0001>
module attributes {stable_mosaic.version = 11 : i64} {
  func.func @_gem_kernel(%arg0: i32, %arg1: memref<2xf32, #tpu.memory_space<smem>>, %arg2: memref<8x256xf32, #tpu.memory_space<vmem>>, %arg3: memref<1x1x8xf32, #tpu.memory_space<vmem>>) attributes {dimension_semantics = [#tpu.dimension_semantics<parallel>], iteration_bounds = array<i64: 1>, scalar_prefetch = 0 : i64, scratch_operands = 0 : i64, tpu.core_type = #tpu.core_type<tc>, window_params = [{transform_indices = @transform_0, window_bounds = array<i64: 2>}, {transform_indices = @transform_1, window_bounds = array<i64: 8, 256>}, {transform_indices = @transform_2, window_bounds = array<i64: 1, 1, 8>}]} {
    %c0 = arith.constant 0 : index
    %0 = memref.load %arg1[%c0] : memref<2xf32, #tpu.memory_space<smem>>
    %c1 = arith.constant 1 : index
    %1 = memref.load %arg1[%c1] : memref<2xf32, #tpu.memory_space<smem>>
    %c0_0 = arith.constant 0 : index
    %c0_1 = arith.constant 0 : index
    %2 = vector.load %arg2[%c0_0, %c0_1] : memref<8x256xf32, #tpu.memory_space<vmem>>, vector<8x256xf32>
    %cst = arith.constant 9.99999997E-7 : f32
    %3 = vector.broadcast %cst : f32 to vector<8x256xf32>
    %4 = arith.maximumf %2, %3 : vector<8x256xf32>
    %c8_i32 = arith.constant 8 : i32
    %5 = arith.muli %arg0, %c8_i32 : i32
    %6 = tpu.iota {dimensions = array<i32: 0>} : vector<8x1xi32>
    %7 = vector.broadcast %5 : i32 to vector<8x1xi32>
    %8 = arith.addi %7, %6 : vector<8x1xi32>
    %c8_i32_2 = arith.constant 8 : i32
    %9 = vector.broadcast %c8_i32_2 : i32 to vector<8x1xi32>
    %10 = arith.cmpi slt, %8, %9 : vector<8x1xi32>
    %cst_3 = arith.constant 1.000000e+00 : f32
    %11 = vector.shape_cast %10 : vector<8x1xi1> to vector<8x1xi1>
    %12 = vector.broadcast %11 : vector<8x1xi1> to vector<8x256xi1>
    %13 = vector.broadcast %cst_3 : f32 to vector<8x256xf32>
    %14 = arith.select %12, %4, %13 : vector<8x256xi1>, vector<8x256xf32>
    %15 = math.log %14 : vector<8x256xf32>
    %16 = vector.broadcast %0 : f32 to vector<8x256xf32>
    %17 = arith.mulf %16, %15 : vector<8x256xf32>
    %18 = math.exp %17 : vector<8x256xf32>
    %cst_4 = arith.constant dense<0.000000e+00> : vector<8xf32>
    %19 = vector.multi_reduction <add>, %18, %cst_4 [1] : vector<8x256xf32> to vector<8xf32>
    %20 = vector.shape_cast %19 : vector<8xf32> to vector<8x1xf32>
    %cst_5 = arith.constant 2.560000e+02 : f32
    %21 = vector.broadcast %cst_5 : f32 to vector<8x1xf32>
    %22 = arith.divf %20, %21 : vector<8x1xf32>
    %23 = math.log %22 : vector<8x1xf32>
    %24 = vector.broadcast %1 : f32 to vector<8x1xf32>
    %25 = arith.mulf %23, %24 : vector<8x1xf32>
    %26 = math.exp %25 : vector<8x1xf32>
    %27 = tpu.transpose %26, [1, 0] : vector<8x1xf32> -> vector<1x8xf32>
    %c0_6 = arith.constant 0 : index
    %c0_7 = arith.constant 0 : index
    %c0_8 = arith.constant 0 : index
    %28 = vector.load %arg3[%c0_6, %c0_7, %c0_8] : memref<1x1x8xf32, #tpu.memory_space<vmem>>, vector<1x1x8xf32>
    %29 = vector.shape_cast %28 : vector<1x1x8xf32> to vector<1x8xf32>
    %30 = vector.shape_cast %27 : vector<1x8xf32> to vector<1x1x8xf32>
    tpu.vector_store %arg3[%c0_6, %c0_7, %c0_8], %30 {strides = array<i32>} : memref<1x1x8xf32, #tpu.memory_space<vmem>>, vector<1x1x8xf32>,
    return
  }
  func.func @transform_0(%arg0: i32) -> i32 {
    %c0_i32 = arith.constant 0 : i32
    %c0_i32_0 = arith.constant 0 : i32
    return %c0_i32 : i32
  }
  func.func @transform_1(%arg0: i32) -> (i32, i32) {
    %c0_i32 = arith.constant 0 : i32
    %c0_i32_0 = arith.constant 0 : i32
    return %arg0, %c0_i32 : i32, i32
  }
  func.func @transform_2(%arg0: i32) -> (i32, i32, i32) {
    %c0_i32 = arith.constant 0 : i32
    %c0_i32_0 = arith.constant 0 : i32
    %c0_i32_1 = arith.constant 0 : i32
    return %arg0, %c0_i32, %c0_i32_0 : i32, i32, i32
  }
}

</mosaic_0001>

<bundles_post_ra>
// kernel: tpu_custom_call.1
= control target key start
LH: loop header
LB: loop body
LE: loop exit
PB: predicated region body
PF: predicated region fallthrough
CT: control target
= control target key end

     0   :  { %7 = vsyncpa [#allocation5], 0  ;;  %s254_s0 = inlined_call_operand.hbm [shape: f32[2], index: 0, kind: input, shape index: {}]   ;;  %s255_s1 = inlined_call_operand.hbm [shape: f32[8,256], index: 1, kind: input, shape index: {}]   ;;  %s256_s2 = inlined_call_operand.hbm [shape: f32[1,1,8], index: 2, kind: output, shape index: {}]  }
   0x1   :  { %8 = vsyncpa [#allocation3], 0 }
   0x2   :  { %9 = vsyncpa [#allocation4], 0  ;;  %s140_s11 = scalar_lea.hbm %s254_s0, 16 }
   0x3   :  { %p141_p0 = scmp.ne.s32.totalorder %s254_s0, %s140_s11  ;;  %p144_p1 = scmp.lt.u32.totalorder %s140_s11, %s254_s0 }
   0x5   :  { %p146_p2 = pnand %p144_p1, %p141_p0 }
   0x7   :  { %149 = shalt.err (!%p146_p2)
}
   0x8   :  { %s200_s16 = smov [#allocation2]   ;;  %s201_s19 = smov [#allocation6]  }
   0x9   :  { %17 = dma.hbm_to_smem %s254_s0, 16, %s200_s16, [#allocation5]  }
   0xa   :  { %s24_s20 = sshll.u32 %s201_s19, 4  ;;  %s150_s23 = scalar_lea.hbm %s255_s1, 256  ;;  %s25_s20 = int_to_ptr.vmem [resolvable:$true] %s24_s20 }
   0xb   :  { %p151_p3 = scmp.ne.s32.totalorder %s255_s1, %s150_s23  ;;  %p154_p4 = scmp.lt.u32.totalorder %s150_s23, %s255_s1 }
   0xd   :  { %p156_p5 = pnand %p154_p4, %p151_p3 }
   0xf   :  { %159 = shalt.err (!%p156_p5)
}
  0x10   :  { %s160_s28 = scalar_lea.vmem %s25_s20, 256  ;;  %p165_p7 = scmp.lt.s32.totalorder %s25_s20, %s25_s20 }
  0x11   :  { %p161_p6 = scmp.ne.s32.totalorder %s25_s20, %s160_s28  ;;  %p166_p8 = scmp.lt.s32.totalorder %s160_s28, %s160_s28 }
  0x13   :  { %p167_p9 = por %p166_p8, %p165_p7 }
  0x15   :  { %p168_p10 = pnand %p167_p9, %p161_p6 }
  0x17   :  { %171 = shalt.err (!%p168_p10)
}
  0x18   :  { %27 = dma.hbm_to_vmem [thread:$0]  %s255_s1, 256, %s25_s20, [#allocation3]  }
  0x19   :  { %194 = dma.done.wait [#allocation5], 16  }
  0x1a   :  { %195 = vsyncadd [#allocation5], 4294967280 }
  0x1b   :  { %196 = dma.done.wait [#allocation3], 256  }
  0x1c   :  { %197 = vsyncadd [#allocation3], 4294967040 }
  0x1d   :  { %34 = sfence }
  0x1e   :  { %v37_v0 = vld [vmem:[#allocation6] sm:$0xff]  ;;  %v38_v1 = vld [vmem:[#allocation6 + $0x8] sm:$0xff]  ;;  %s35_s30 = sld [smem:[#allocation2]]  ;;  %s123_s1 = sld [smem:[#allocation2 + $0x1]]  ;;  %vm105_vm0 = vcmask 57344  }
  0x1f   :  { %v39_v2 = vmax.f32 %v37_v0, 1e-06  ;;  %v40_v3 = vmax.f32 %v38_v1, 1e-06  ;;  %s202_s3 = smov [#allocation7]  }
  0x20   :  { %s113_s4 = sshll.u32 %s202_s3, 4  ;;  %s114_s4 = int_to_ptr.vmem [resolvable:$true] %s113_s4 }
  0x21   :  { %128 = vlog2.f32 %v39_v2  ;;  %s172_s5 = scalar_lea.vmem %s114_s4, 16  ;;  %s176_s6 = scalar_lea.vmem %s114_s4, 32 }
  0x22   :  { %130 = vlog2.f32 %v40_v3  ;;  %p173_p11 = scmp.ne.s32.totalorder %s114_s4, %s172_s5  ;;  %p177_p12 = scmp.lt.s32.totalorder %s114_s4, %s114_s4 }
  0x23   :  { %p178_p13 = scmp.lt.s32.totalorder %s176_s6, %s172_s5 }
  0x24   :  { %v55_v5 = vstv %s35_s30  ;;  %v69_v19 = vstv %s123_s1 }
  0x25   :  { %p179_p0 = por %p178_p13, %p177_p12 }
  0x27   :  { %p180_p1 = pnand %p179_p0, %p173_p11 }
  0x2b   :  { %v129_v4 = vpop.eup %128 }
  0x2c   :  { %v131_v6 = vpop.eup %130  ;;  %v52_v7 = vmul.f32 0.6931472, %v129_v4 }
  0x2d   :  { %v54_v8 = vmul.f32 0.6931472, %v131_v6 }
  0x2e   :  { %v56_v9 = vmul.f32 %v55_v5, %v52_v7 }
  0x2f   :  { %v57_v10 = vmul.f32 %v55_v5, %v54_v8 }
  0x30   :  { %v58_v11 = vmul.f32 1.442695, %v56_v9 }
  0x31   :  { %v60_v12 = vmul.f32 1.442695, %v57_v10 }
  0x32   :  { %132 = vpow2.f32 %v58_v11 }
  0x33   :  { %134 = vpow2.f32 %v60_v12 }
  0x3c   :  { %v133_v13 = vpop.eup %132 }
  0x3d   :  { %v135_v14 = vpop.eup %134 }
  0x3e   :  { %v62_v15 = vadd.f32 %v135_v14, %v133_v13 }
  0x40   :  { %63 = vadd.xlane.f32.xlu0 %v62_v15 }
  0xcd   :  { %v64_v16 = vpop.xlane.xlu0 %63 }
  0xce   :  { %v66_v17 = vmul.f32 0.00390625, %v64_v16 }
  0xd0   :  { %136 = vlog2.f32 %v66_v17 }
  0xda   :  { %v137_v18 = vpop.eup %136 }
  0xdb   :  { %v68_v20 = vmul.f32 0.6931472, %v137_v18 }
  0xdd   :  { %v70_v21 = vmul.f32 %v69_v19, %v68_v20 }
  0xdf   :  { %v71_v22 = vmul.f32 1.442695, %v70_v21 }
  0xe1   :  { %138 = vpow2.f32 %v71_v22 }
  0xeb   :  { %v139_v23 = vpop.eup %138 }
  0xec   :  { %73 = vxpose.xlu0.b32.start.end [1/1] (short) (narrow) %v139_v23, 8 }
 0x16c   :  { %v89_v24 = vpop.trf.xlu0 }
 0x16d   :  { %106 = vst.msk [vmem:[#allocation7] sm:$0x1] %vm105_vm0, %v89_v24 }
 0x16e   :  { %183 = shalt.err (!%p180_p1)
}
 0x16f   :  { %s184_s9 = scalar_lea.hbm %s256_s2, 16 }
 0x170   :  { %p185_p2 = scmp.ne.s32.totalorder %s256_s2, %s184_s9  ;;  %p188_p3 = scmp.lt.u32.totalorder %s184_s9, %s256_s2 }
 0x172   :  { %p190_p4 = pnand %p188_p3, %p185_p2 }
 0x174   :  { %193 = shalt.err (!%p190_p4)
}
 0x175   :  { %116 = dma.vmem_to_hbm [thread:$0]  %s114_s4, 16, %s256_s2, [#allocation4]  }
 0x176   :  { %198 = dma.done.wait [#allocation4], 16  }
 0x177   :  { %199 = vsyncadd [#allocation4], 4294967280 }
 0x178   :  { %120 = vsyncpa [#allocation3], 1 }
 0x179   :  { %121 = vsyncpa [#allocation4], 1 }
 0x17a   :  { %122 = vsyncpa [#allocation5], 1 }

</bundles_post_ra>
